<compile_context>
chip_gen: v5e
topology: v5e:2x2
jax: 0.10.0
libtpu: 0.0.40
codegen_flags: <defaults>
</compile_context>

<pallas_src>
import functools

import jax
import jax.numpy as jnp
from jax.experimental import pallas as pl
from jax.experimental.pallas import tpu as pltpu


def layernorm_kernel(x_ref, w_ref, b_ref, o_ref, *, eps, hidden, hidden_padded):
    x = x_ref[...].astype(jnp.float32)                    # (tile_rows, Hp)
    if hidden != hidden_padded:
        # Mask the lane-padding columns so statistics use the true width.
        col = jax.lax.broadcasted_iota(jnp.int32, x.shape, dimension=1)
        valid = col < hidden
        x = jnp.where(valid, x, 0.0)
        inv_h = jnp.float32(1.0 / hidden)
        u = jnp.sum(x, axis=-1, keepdims=True) * inv_h    # mean over true hidden
        xc = jnp.where(valid, x - u, 0.0)
        s = jnp.sum(xc * xc, axis=-1, keepdims=True) * inv_h
    else:
        u = jnp.mean(x, axis=-1, keepdims=True)           # mean over hidden
        xc = x - u
        s = jnp.mean(xc * xc, axis=-1, keepdims=True)     # biased variance
    inv = jax.lax.rsqrt(s + eps)                          # eps inside sqrt (TF style)
    w = w_ref[...].astype(jnp.float32)                    # (1, Hp)
    b = b_ref[...].astype(jnp.float32)                    # (1, Hp)
    o_ref[...] = (w * (xc * inv) + b).astype(o_ref.dtype)


def _pick_tile_rows(rows, hidden_padded, itemsize, working_budget_bytes):
    """Largest sublane-aligned row tile that (a) fits the VMEM budget counting
    both the double-buffered IO tiles and the in-kernel f32 temporaries, and
    (b) still leaves >= ~8 grid steps so the pipeline / both v7x TCs stay busy.
    """
    # Per row: double-buffered input + output tiles (2 in + 2 out = 4 buffers
    # of itemsize bytes) plus ~3 whole-tile f32 intermediates inside the body
    # (x in f32, centered x, affine result).
    bytes_per_row = (4 * itemsize + 3 * 4) * hidden_padded
    fit_rows = max(1, working_budget_bytes // max(1, bytes_per_row))

    # Sublane packing: f32 -> 8, bf16 -> 16, int8/fp8 -> 32 rows.
    sublane = 8 * max(1, 4 // max(1, itemsize))
    if rows <= sublane:
        return rows                       # full-extent block (exempt from alignment)

    max_tile_rows = 1024                  # mem-bound roofline is flat past ~512 rows
    min_grid = 8                          # keep prefetch/writeback pipelining alive
    cap_for_grid = max(1, -(-rows // min_grid))   # ceil(rows / min_grid)

    t = min(fit_rows, max_tile_rows, cap_for_grid)
    t = max(sublane, (t // sublane) * sublane)
    return min(t, rows)


def layer_norm(x, weight, bias, eps=1e-12, tile_rows=None):
    orig_shape = x.shape
    hidden = orig_shape[-1]
    rows = 1
    for d in orig_shape[:-1]:
        rows *= int(d)

    # Lane-dense output layout: pad hidden up to a multiple of 128.
    hidden_padded = ((hidden + 127) // 128) * 128

    x2 = x.reshape(rows, hidden)
    w2 = weight.reshape(1, hidden)
    b2 = bias.reshape(1, hidden)
    if hidden_padded != hidden:
        pad = hidden_padded - hidden
        x2 = jnp.pad(x2, ((0, 0), (0, pad)))
        w2 = jnp.pad(w2, ((0, 0), (0, pad)))     # padded weight = 0
        b2 = jnp.pad(b2, ((0, 0), (0, pad)))     # padded bias   = 0

    # Generation-aware VMEM limits (64 MiB/TC on v7x, 128 MiB on v5e/v6e).
    try:
        vmem_capacity = int(pltpu.get_tpu_info().vmem_capacity_bytes)
    except Exception:
        vmem_capacity = 64 * 1024 * 1024         # safest assumption (v7x per-TC)
    vmem_limit = min(int(0.72 * vmem_capacity), 100 * 1024 * 1024)
    working_budget = int(0.70 * vmem_limit)

    itemsize = jnp.dtype(x.dtype).itemsize
    if tile_rows is None:
        tile_rows = _pick_tile_rows(rows, hidden_padded, itemsize, working_budget)

    grid = (pl.cdiv(rows, tile_rows),)

    kernel = functools.partial(
        layernorm_kernel, eps=eps, hidden=hidden, hidden_padded=hidden_padded)

    out = pl.pallas_call(
        kernel,
        out_shape=jax.ShapeDtypeStruct((rows, hidden_padded), x.dtype),
        grid_spec=pltpu.PrefetchScalarGridSpec(
            num_scalar_prefetch=0,
            grid=grid,
            in_specs=[
                pl.BlockSpec((tile_rows, hidden_padded), lambda i: (i, 0)),
                pl.BlockSpec((1, hidden_padded), lambda i: (0, 0)),
                pl.BlockSpec((1, hidden_padded), lambda i: (0, 0)),
            ],
            out_specs=pl.BlockSpec((tile_rows, hidden_padded), lambda i: (i, 0)),
        ),
        compiler_params=pltpu.CompilerParams(
            dimension_semantics=("parallel",),
            vmem_limit_bytes=vmem_limit,
        ),
    )(x2, w2, b2)

    if hidden_padded != hidden:
        out = out[:, :hidden]
    return out.reshape(orig_shape)


if __name__ == "__main__":
    key = jax.random.PRNGKey(0)
    batch, seq, hidden = 2, 8, 32
    x = jax.random.normal(key, (batch, seq, hidden), dtype=jnp.float32)

    # Deterministic parameters matching nn.Parameter(torch.ones/zeros(hidden)).
    weight = jnp.ones((hidden,), dtype=jnp.float32)
    bias = jnp.zeros((hidden,), dtype=jnp.float32)
    eps = 1e-12  # module default (TF/BERT style; differs from nn.LayerNorm's 1e-5)

    def ref_ln(xx, ww, bb, ee):
        u = jnp.mean(xx, axis=-1, keepdims=True)
        s = jnp.mean((xx - u) ** 2, axis=-1, keepdims=True)
        return ww * ((xx - u) / jnp.sqrt(s + ee)) + bb

    y = jax.block_until_ready(layer_norm(x, weight, bias, eps=eps))
    assert jnp.allclose(y, ref_ln(x, weight, bias, eps), atol=1e-5, rtol=1e-5), \
        "mismatch vs reference (main case)"

    # Ragged-rows + lane-padding check: rows % tile_rows != 0, hidden % 128 != 0,
    # non-trivial affine exercises the padded weight/bias path.
    x2 = jax.random.normal(jax.random.PRNGKey(1), (3, 5, hidden), dtype=jnp.float32)
    w2 = jax.random.normal(jax.random.PRNGKey(2), (hidden,), dtype=jnp.float32)
    b2 = jax.random.normal(jax.random.PRNGKey(3), (hidden,), dtype=jnp.float32)
    y2 = jax.block_until_ready(layer_norm(x2, w2, b2, eps=eps))
    assert jnp.allclose(y2, ref_ln(x2, w2, b2, eps), atol=1e-5, rtol=1e-5), \
        "mismatch vs reference (ragged rows case)"

    print("KERNEL_OK")
</pallas_src>

<mosaic_0001>
module attributes {stable_mosaic.version = 11 : i64} {
  func.func @layernorm_kernel(%arg0: i32, %arg1: memref<8x128xf32, #tpu.memory_space<vmem>>, %arg2: memref<1x128xf32, #tpu.memory_space<vmem>>, %arg3: memref<1x128xf32, #tpu.memory_space<vmem>>, %arg4: memref<8x128xf32, #tpu.memory_space<vmem>>) attributes {dimension_semantics = [#tpu.dimension_semantics<parallel>], iteration_bounds = array<i64: 2>, scalar_prefetch = 0 : i64, scratch_operands = 0 : i64, tpu.core_type = #tpu.core_type<tc>, window_params = [{transform_indices = @transform_0, window_bounds = array<i64: 8, 128>}, {pipeline_mode = #tpu.pipeline_mode<synchronous>, transform_indices = @transform_1, window_bounds = array<i64: 1, 128>}, {pipeline_mode = #tpu.pipeline_mode<synchronous>, transform_indices = @transform_2, window_bounds = array<i64: 1, 128>}, {transform_indices = @transform_3, window_bounds = array<i64: 8, 128>}]} {
    %c0 = arith.constant 0 : index
    %c0_0 = arith.constant 0 : index
    %0 = vector.load %arg1[%c0, %c0_0] : memref<8x128xf32, #tpu.memory_space<vmem>>, vector<8x128xf32>
    %1 = tpu.iota {dimensions = array<i32: 1>} : vector<8x128xi32>
    %c32_i32 = arith.constant 32 : i32
    %2 = vector.broadcast %c32_i32 : i32 to vector<8x128xi32>
    %3 = arith.cmpi slt, %1, %2 : vector<8x128xi32>
    %cst = arith.constant 0.000000e+00 : f32
    %4 = vector.broadcast %cst : f32 to vector<8x128xf32>
    %5 = arith.select %3, %0, %4 : vector<8x128xi1>, vector<8x128xf32>
    %cst_1 = arith.constant dense<0.000000e+00> : vector<8xf32>
    %6 = vector.multi_reduction <add>, %5, %cst_1 [1] : vector<8x128xf32> to vector<8xf32>
    %7 = vector.shape_cast %6 : vector<8xf32> to vector<8x1xf32>
    %cst_2 = arith.constant 3.125000e-02 : f32
    %8 = vector.broadcast %cst_2 : f32 to vector<8x1xf32>
    %9 = arith.mulf %7, %8 : vector<8x1xf32>
    %10 = vector.broadcast %9 : vector<8x1xf32> to vector<8x128xf32>
    %11 = arith.subf %5, %10 : vector<8x128xf32>
    %cst_3 = arith.constant 0.000000e+00 : f32
    %12 = vector.broadcast %cst_3 : f32 to vector<8x128xf32>
    %13 = arith.select %3, %11, %12 : vector<8x128xi1>, vector<8x128xf32>
    %14 = arith.mulf %13, %13 : vector<8x128xf32>
    %cst_4 = arith.constant dense<0.000000e+00> : vector<8xf32>
    %15 = vector.multi_reduction <add>, %14, %cst_4 [1] : vector<8x128xf32> to vector<8xf32>
    %16 = vector.shape_cast %15 : vector<8xf32> to vector<8x1xf32>
    %cst_5 = arith.constant 3.125000e-02 : f32
    %17 = vector.broadcast %cst_5 : f32 to vector<8x1xf32>
    %18 = arith.mulf %16, %17 : vector<8x1xf32>
    %cst_6 = arith.constant 9.99999996E-13 : f32
    %19 = vector.broadcast %cst_6 : f32 to vector<8x1xf32>
    %20 = arith.addf %18, %19 : vector<8x1xf32>
    %21 = math.rsqrt %20 : vector<8x1xf32>
    %c0_7 = arith.constant 0 : index
    %c0_8 = arith.constant 0 : index
    %22 = vector.load %arg2[%c0_7, %c0_8] : memref<1x128xf32, #tpu.memory_space<vmem>>, vector<1x128xf32>
    %c0_9 = arith.constant 0 : index
    %c0_10 = arith.constant 0 : index
    %23 = vector.load %arg3[%c0_9, %c0_10] : memref<1x128xf32, #tpu.memory_space<vmem>>, vector<1x128xf32>
    %24 = vector.broadcast %21 : vector<8x1xf32> to vector<8x128xf32>
    %25 = arith.mulf %13, %24 : vector<8x128xf32>
    %26 = vector.broadcast %22 : vector<1x128xf32> to vector<8x128xf32>
    %27 = arith.mulf %26, %25 : vector<8x128xf32>
    %28 = vector.broadcast %23 : vector<1x128xf32> to vector<8x128xf32>
    %29 = arith.addf %27, %28 : vector<8x128xf32>
    %c0_11 = arith.constant 0 : index
    %c0_12 = arith.constant 0 : index
    %30 = vector.load %arg4[%c0_11, %c0_12] : memref<8x128xf32, #tpu.memory_space<vmem>>, vector<8x128xf32>
    tpu.vector_store %arg4[%c0_11, %c0_12], %29 {strides = array<i32>} : memref<8x128xf32, #tpu.memory_space<vmem>>, vector<8x128xf32>,
    return
  }
  func.func @transform_0(%arg0: i32) -> (i32, i32) {
    %c0_i32 = arith.constant 0 : i32
    %c0_i32_0 = arith.constant 0 : i32
    return %arg0, %c0_i32 : i32, i32
  }
  func.func @transform_1(%arg0: i32) -> (i32, i32) {
    %c0_i32 = arith.constant 0 : i32
    %c0_i32_0 = arith.constant 0 : i32
    %c0_i32_1 = arith.constant 0 : i32
    return %c0_i32, %c0_i32_0 : i32, i32
  }
  func.func @transform_2(%arg0: i32) -> (i32, i32) {
    %c0_i32 = arith.constant 0 : i32
    %c0_i32_0 = arith.constant 0 : i32
    %c0_i32_1 = arith.constant 0 : i32
    return %c0_i32, %c0_i32_0 : i32, i32
  }
  func.func @transform_3(%arg0: i32) -> (i32, i32) {
    %c0_i32 = arith.constant 0 : i32
    %c0_i32_0 = arith.constant 0 : i32
    return %arg0, %c0_i32 : i32, i32
  }
}

</mosaic_0001>

<bundles_post_ra>
// kernel: tpu_custom_call.1
= control target key start
LH: loop header
LB: loop body
LE: loop exit
PB: predicated region body
PF: predicated region fallthrough
CT: control target
= control target key end

     0   :  { %8 = vsyncpa [#allocation3], 0  ;;  %s709_s0 = inlined_call_operand.hbm [shape: f32[16,128], index: 0, kind: input, shape index: {}]   ;;  %s710_s1 = inlined_call_operand.hbm [shape: f32[1,128], index: 1, kind: input, shape index: {}]   ;;  %s711_s2 = inlined_call_operand.vmem [shape: f32[1,128], index: 2, kind: input, shape index: {}]   ;;  %s712_s3 = inlined_call_operand.hbm [shape: f32[16,128], index: 3, kind: output, shape index: {}]  }
   0x1   :  { %10 = vsyncpa [#allocation3 + $0x1], 0 }
   0x2   :  { %11 = vsyncpa [#allocation6], 0 }
   0x3   :  { %12 = vsyncpa [#allocation4], 0 }
   0x4   :  { %14 = vsyncpa [#allocation4 + $0x1], 0  ;;  %s564_s12 = smov 0   ;;  %s566_s13 = smov 0  }
   0x5   :  { %s568_s14 = smov 0   ;;  %s570_s15 = smov 0  }
   0x6 LB: > { %s585_s16 = sadd.s32 4294967295, %s541_s15   ;;  %s336_s17 = sadd.s32 4294967294, %s541_s15   ;;  %s541_s15 = sphi %s570_s15, %s722_s15   ;;  %s537_s14 = sphi %s568_s14, %s721_s14   ;;  %s533_s13 = sphi %s566_s13, %s720_s13   ;;  %s529_s12 = sphi %s564_s12, %s719_s12  }
   0x7   : > { %p40_p0 = scmp.ne.s32.totalorder %s533_s13, %s529_s12  ;;  %p41_p1 = scmp.eq.s32.totalorder %s585_s16, 0 }
   0x8   : > { %p106_p2 = scmp.eq.s32.totalorder %s585_s16, 1  ;;  %p112_p3 = scmp.eq.s32.totalorder %s336_s17, 1 }
   0x9   : > { %p594_p4 = por %p41_p1, %p40_p0  ;;  %p337_p5 = scmp.ge.s32.totalorder %s541_s15, 1 }
   0xa   : > { %p599_p6 = por %p112_p3, %p40_p0  ;;  %p119_p7 = scmp.lt.s32.totalorder %s541_s15, 3 }
   0xb   : > { %s131_s22 = sshll.u32 %s710_s1, 4  ;;  %s543_s24 = smov [#allocation5]   ;;  %s132_s22 = int_to_ptr.hbm [resolvable:$true] %s131_s22 }
   0xc   : > { %p607_p8 = pnand %p337_p5, %p119_p7  ;;  %s133_s25 = sshll.u32 %s543_s24, 4  ;;  %s134_s25 = int_to_ptr.vmem [resolvable:$true] %s133_s25 }
   0xd   : > { %s617_s26 = sadd.s32 1, %s541_s15   ;;  %s27_s27 = sadd.s32 1, %s537_s14 }
   0xe   : > { %p358_p10 = pneg %p607_p8  ;;  %s24_s28 = ssub.s32 %s541_s15, %s617_s26 }
   0xf   : > { %p25_p12 = scmp.eq.s32.totalorder %s24_s28, 0  ;;  %p34_p13 = scmp.ne.s32.totalorder %s537_s14, %s533_s13 }
  0x10   : > { %p359_p11 = pnand %p358_p10, %p41_p1  ;;  %p35_p0 = scmp.eq.s32.totalorder %s541_s15, 0 }
  0x11   : > { %s626_s29 = scalar_select %p25_p12, %s537_s14, %s27_s27  }
  0x12   : > { %361 = dma.hbm_to_vmem [thread:$0]  (!%p359_p11), %s132_s22, 16, %s134_s25, [#allocation6]  }
  0x13   : > { %p630_p3 = por %p106_p2, %p34_p13  ;;  %p371_p5 = scmp.lt.s32.totalorder %s541_s15, 2 }
  0x14   : > { %s147_s4 = sand.u32 1, %s537_s14   ;;  %s341_s5 = sshll.u32 %s541_s15, 3 }
  0x15   : > { %p36_p7 = por %p35_p0, %p34_p13  ;;  %s340_s6 = sshll.u32 %s147_s4, 3 }
  0x16   : > { %s155_s9 = scalar_lea.hbm %s709_s0, %s341_s5  ;;  %s151_s11 = scalar_lea.vmem [#allocation2], %s340_s6 }
  0x17   : > { %s157_s10 = sshll.u32 %s155_s9, 4  ;;  %s159_s17 = sshll.u32 %s151_s11, 4  ;;  %s158_s10 = int_to_ptr.hbm [resolvable:$true] %s157_s10  ;;  %s160_s17 = int_to_ptr.vmem [resolvable:$true] %s159_s17 }
  0x18   : > { %p640_p10 = pnand %p371_p5, %p36_p7  ;;  %s148_s21 = scalar_lea.sflag [#allocation3], %s147_s4 }
  0x19   : > { %s441_s22 = sshra.s32 %s158_s10, 4  ;;  %s448_s28 = scalar_lea.hbm %s709_s0, 16  ;;  %s442_s22 = int_to_ptr.hbm [resolvable:$true] %s441_s22 }
  0x1a   : > { %s443_s24 = scalar_lea.hbm %s442_s22, 8  ;;  %p445_p11 = pneg %p640_p10 }
  0x1b   : > { %p444_p2 = scmp.ne.s32.totalorder %s442_s22, %s443_s24  ;;  %p449_p0 = scmp.lt.s32.totalorder %s442_s22, %s709_s0 }
  0x1c   : > { %p450_p5 = scmp.lt.s32.totalorder %s448_s28, %s443_s24 }
  0x1d   : > { %p446_p12 = pnand %p445_p11, %p444_p2 }
  0x1e   : > { %p451_p7 = por %p450_p5, %p449_p0 }
  0x1f   : > { %p447_p13 = pneg %p446_p12 }
  0x21   : > { %p452_p9 = pnand %p451_p7, %p447_p13 }
  0x23   : > { %455 = shalt.err (!%p452_p9)
}
  0x24   : > { %365 = dma.hbm_to_vmem [thread:$0]  (!%p640_p10), %s158_s10, 128, %s160_s17, %s148_s21  }
  0x25   : > { %168 = sbr.rel (%p607_p8) target bundleno = 321 (0x141), region = 32  ;;  %s657_s4 = sand.u32 (!%p607_p8), 1, %s533_s13  }
  0x26   : > { %s343_s7 = sshll.u32 (!%p607_p8), %s657_s4, 3  ;;  %s171_s8 = scalar_lea.sflag (!%p607_p8), [#allocation3], %s657_s4 }
  0x27   : > { %s174_s9 = scalar_lea.vmem (!%p607_p8), [#allocation2], %s343_s7 }
  0x2a   : > { %516 = dma.done.wait (%p594_p4), %s171_s8, 128  }
  0x2b   : > { %518 = vsyncadd (%p594_p4), %s171_s8, 4294967168 }
  0x2c   : > { %520 = dma.done.wait (%p41_p1), [#allocation6], 16  }
  0x2d   : > { %522 = vsyncadd (%p41_p1), [#allocation6], 4294967280  ;;  %v204_v0 = vlaneseq  ;;  %v203_v2 = vld [vmem:[%s174_s9] sm:$0xff]  ;;  %s347_s18 = sshll.u32 %s585_s16, 3  ;;  %v407_v18 = vld [vmem:[#allocation5] ss:$0 sm:$0xff] }
  0x2e   : > { %s251_s11 = scalar_lea.hbm %s712_s3, %s347_s18  ;;  %v408_v21 = vld [vmem:[%s711_s2] ss:$0 sm:$0xff]  ;;  %s202_s21 = scalar_lea.vmem [#allocation7], %s343_s7 }
  0x2f   : > { %v205_v1 = vand.u32 127, %v204_v0  ;;  %s253_s22 = sshll.u32 %s202_s21, 4  ;;  %s255_s16 = sshll.u32 %s251_s11, 4  ;;  %s254_s22 = int_to_ptr.vmem [resolvable:$true] %s253_s22  ;;  %s256_s16 = int_to_ptr.hbm [resolvable:$true] %s255_s16 }
  0x30   : > { %s241_s24 = scalar_lea.sflag [#allocation4], %s657_s4  ;;  %s485_s25 = sshra.s32 %s256_s16, 4  ;;  %s486_s25 = int_to_ptr.hbm [resolvable:$true] %s485_s25 }
  0x31   : > { %vm206_vm0 = vcmp.lt.s32.totalorder %v205_v1, 32  ;;  %s487_s27 = scalar_lea.hbm %s486_s25, 8  ;;  %s491_s6 = scalar_lea.hbm %s712_s3, 16 }
  0x32   : > { %v207_v3 = vsel %vm206_vm0, %v203_v2, 0.0  ;;  %p488_p1 = scmp.ne.s32.totalorder %s486_s25, %s487_s27  ;;  %p492_p9 = scmp.lt.s32.totalorder %s486_s25, %s712_s3 }
  0x33   : > { %208 = vadd.xlane.f32.xlu0 %v207_v3  ;;  %p493_p10 = scmp.lt.s32.totalorder %s491_s6, %s487_s27 }
  0x34   : > { %p489_p4 = pnand %p488_p1, %p630_p3 }
  0x35   : > { %p494_p2 = por %p493_p10, %p492_p9 }
  0x36   : > { %p490_p8 = pneg %p489_p4 }
  0x38   : > { %p495_p11 = pnand %p494_p2, %p490_p8 }
  0xa6   : > { %v209_v4 = vpop.xlane.xlu0 %208 }
  0xa7   : > { %v210_v5 = vmul.f32 0.03125, %v209_v4 }
  0xa9   : > { %v211_v6 = vsub.f32 %v207_v3, %v210_v5 }
  0xab   : > { %v212_v7 = vsel %vm206_vm0, %v211_v6, 0.0 }
  0xac   : > { %v213_v8 = vmul.f32 %v212_v7, %v212_v7 }
  0xae   : > { %214 = vadd.xlane.f32.xlu0 %v213_v8 }
 0x121   : > { %v215_v9 = vpop.xlane.xlu0 %214 }
 0x122   : > { %v216_v10 = vmul.f32 0.03125, %v215_v9 }
 0x124   : > { %v217_v11 = vadd.f32 1e-12, %v216_v10 }
 0x126   : > { %409 = vrsqrt.f32 %v217_v11  ;;  %vm224_vm2 = vweird.f32 %v217_v11 }
 0x12c   : > { %v410_v12 = vpop.eup %409 }
 0x12d   : > { %v219_v13 = vmul.f32 %v410_v12, %v217_v11  ;;  %vm225_vm1 = vweird.f32 %v410_v12 }
 0x12e   : > { %vm226_vm3 = vmor %vm224_vm2, %vm225_vm1 }
 0x12f   : > { %v220_v14 = vmul.f32 %v410_v12, %v219_v13 }
 0x131   : > { %v221_v15 = vmul.f32 0.5, %v220_v14 }
 0x133   : > { %v222_v16 = vsub.f32 1.5, %v221_v15 }
 0x135   : > { %v223_v17 = vmul.f32 %v410_v12, %v222_v16 }
 0x137   : > { %v227_v19 = vsel %vm226_vm3, %v410_v12, %v223_v17 }
 0x138   : > { %v230_v20 = vmul.f32 %v227_v19, %v212_v7 }
 0x13a   : > { %v234_v22 = vmul.f32 %v407_v18, %v230_v20 }
 0x13c   : > { %v238_v23 = vadd.f32 %v408_v21, %v234_v22 }
 0x13e   : > { %239 = vst [vmem:[%s202_s21] sm:$0xff] %v238_v23 }
 0x13f   : > { %498 = shalt.err (!%p495_p11)
}
 0x140   : > { %356 = dma.vmem_to_hbm [thread:$0]  (%p630_p3), %s254_s22, 128, %s256_s16, %s241_s24  }
 0x141 PF: > { %s267_s4 = sand.u32 1, %s529_s12   ;;  %p718_p12 = scmp.ge.s32.totalorder %s541_s15, 2 }
 0x142   : > { %s268_s9 = scalar_lea.sflag [#allocation4], %s267_s4 }
 0x143   : > { %p367_p13 = pnand %p718_p12, %p599_p6 }
 0x145   : > { %p368_p0 = pneg %p367_p13 }
 0x147   : > { %524 = dma.done.wait (%p368_p0), %s268_s9, 128  }
 0x148   : > { %526 = vsyncadd (%p368_p0), %s268_s9, 4294967168  ;;  %p17_p5 = scmp.ge.s32.totalorder %s617_s26, 4   ;;  %s719_s12 = smov %s533_s13 }
 0x149   : > { %s720_s13 = smov %s537_s14  ;;  %s721_s14 = smov %s626_s29 }
 0x14a   : > { %s722_s15 = smov %s617_s26  ;;  %19 = sbr.rel (!%p17_p5) target bundleno = 6 (0x6), region = 81 }
 0x14f   :  { %274 = vsyncpa [#allocation3], 1 }
 0x150   :  { %276 = vsyncpa [#allocation3 + $0x1], 1 }
 0x151   :  { %277 = vsyncpa [#allocation6], 1 }
 0x152   :  { %278 = vsyncpa [#allocation4], 1 }
 0x153   :  { %280 = vsyncpa [#allocation4 + $0x1], 1 }

</bundles_post_ra>
